<compile_context>
chip_gen: v5e
topology: v5e:2x2
jax: 0.10.0
libtpu: 0.0.40
codegen_flags: <defaults>
</compile_context>

<pallas_src>
import numpy as np
import jax
import jax.numpy as jnp
from jax.experimental import pallas as pl
from jax.experimental.pallas import tpu as pltpu


# ---------------------------------------------------------------------------
# Constant setup (tiny, vectorized numpy; no O(P^2) gather matrix)
# ---------------------------------------------------------------------------
def _make_wrap_masks(height, width, k, pad):
    """0/1 lane masks over the flattened H*W output axis.

    After zero-padding H and flattening, tap (kh, kw) is a pure shift of the
    flat axis; elements whose column index would cross the image border wrap
    into the neighbouring row and must be zeroed (this implements the
    left/right zero padding).  mask[t, 0, q] == 1 iff output column q % W reads
    a real (non-padding) input column for tap t.
    """
    t_total = k * k
    p_out = height * width
    ow = np.arange(p_out) % width
    m = np.zeros((t_total, 1, p_out), np.float32)
    for t in range(t_total):
        kw = t % k
        valid = (ow >= pad - kw) & (ow < width + pad - kw)
        m[t, 0, valid] = 1.0
    return jnp.asarray(m, dtype=jnp.bfloat16)


def init_params(key, in_channels, out_channels, kernel_size):
    k_w, k_b = jax.random.split(key)
    conv_w = jax.random.normal(
        k_w, (out_channels, in_channels, kernel_size, kernel_size), jnp.float32) * 0.1
    conv_b = jax.random.normal(k_b, (out_channels,), jnp.float32) * 0.1

    # Kernel-ready layouts: one lane-dense (C_out, K*K*C_in) bf16 weight slab
    # (row order kh, kw, ci -> matches the im2col slab), f32 bias column.
    w_mat = jnp.transpose(conv_w, (0, 2, 3, 1)).reshape(
        out_channels, kernel_size * kernel_size * in_channels).astype(jnp.bfloat16)
    b_col = conv_b[:, None]
    return {"conv_w": conv_w, "conv_b": conv_b,          # PyTorch-shaped (reference)
            "w_mat": w_mat, "b_col": b_col,              # kernel-shaped
            "kernel_size": kernel_size}


# ---------------------------------------------------------------------------
# Forward wrapper + fused kernel
# ---------------------------------------------------------------------------
def basic_conv2d_forward(x_nchw, params, *, stride=1, padding=0):
    n, c_in, h, w = x_nchw.shape
    k = params["kernel_size"]
    c_out = params["b_col"].shape[0]
    t_total = k * k

    # This fused kernel covers the stride-1 "same"-shaped convolutions that
    # BasicConv2d is used with in GoogLeNet (1x1 p0, 3x3 p1, 5x5 p2).
    # TODO(synk): general stride / non-"same" padding needs strided tap slices.
    assert stride == 1 and 2 * padding == k - 1, "kernel supports stride=1 'same' conv"

    p_out = h * w
    pad = padding
    flat_len = (h + 2 * pad) * w + 2 * pad

    masks = _make_wrap_masks(h, w, k, pad)
    w_mat = params["w_mat"]
    b_col = params["b_col"]

    # Pad H with zeros, flatten spatial (free reshape), pad the flat axis by
    # `pad` on each end so every tap shift stays in-bounds; cast to bf16.
    x_p = jnp.pad(x_nchw, ((0, 0), (0, 0), (pad, pad), (0, 0)))
    x_f = x_p.reshape(n, c_in, (h + 2 * pad) * w)
    x_e = jnp.pad(x_f, ((0, 0), (0, 0), (pad, pad))).astype(jnp.bfloat16)

    def kernel(x_ref, m_ref, w_ref, b_ref, out_ref, patch_ref):
        # x_ref    : (1, C_in, L)       padded + flattened bf16 input
        # m_ref    : (T, 1, P_out)      0/1 border masks (bf16)
        # w_ref    : (C_out, T*C_in)    weights as one lane-dense slab (bf16)
        # b_ref    : (C_out, 1)         f32 bias column
        # out_ref  : (1, C_out, P_out)  f32 output
        # patch_ref: (T*C_in, P_out)    bf16 im2col scratch in VMEM
        for t in range(t_total):                 # K*K static taps, static starts
            kh, kw = divmod(t, k)
            start = kh * w + kw                  # flat-axis shift for this tap
            sl = x_ref[0, :, pl.ds(start, p_out)]            # (C_in, P_out)
            patch_ref[pl.ds(t * c_in, c_in), :] = sl * m_ref[t]
        acc = jnp.dot(w_ref[...], patch_ref[...],
                      preferred_element_type=jnp.float32)    # (C_out, P_out)
        out_ref[0] = jnp.maximum(acc + b_ref[...], 0.0).astype(out_ref.dtype)

    out = pl.pallas_call(
        kernel,
        out_shape=jax.ShapeDtypeStruct((n, c_out, p_out), jnp.float32),
        grid=(n,),
        in_specs=[
            pl.BlockSpec((1, c_in, flat_len), lambda i: (i, 0, 0)),
            pl.BlockSpec((t_total, 1, p_out), lambda i: (0, 0, 0)),
            pl.BlockSpec((c_out, t_total * c_in), lambda i: (0, 0)),
            pl.BlockSpec((c_out, 1), lambda i: (0, 0)),
        ],
        out_specs=pl.BlockSpec((1, c_out, p_out), lambda i: (i, 0, 0)),
        scratch_shapes=[pltpu.VMEM((t_total * c_in, p_out), jnp.bfloat16)],
        compiler_params=pltpu.CompilerParams(dimension_semantics=("parallel",)),
    )(x_e, masks, w_mat, b_col)

    return out.reshape(n, c_out, h, w)           # free reshape back to NCHW


# ---------------------------------------------------------------------------
# Pure-JAX reference mirroring the PyTorch forward (Conv2d + ReLU).
# ---------------------------------------------------------------------------
def reference_forward(x_nchw, conv_w, conv_b, *, stride, padding):
    y = jax.lax.conv_general_dilated(
        x_nchw, conv_w,
        window_strides=(stride, stride),
        padding=[(padding, padding), (padding, padding)],
        dimension_numbers=("NCHW", "OIHW", "NCHW"))
    y = y + conv_b[None, :, None, None]
    return jnp.maximum(y, 0.0)


if __name__ == "__main__":
    N, C_IN, C_OUT, H, W = 2, 4, 8, 16, 16
    K, STRIDE, PAD = 3, 1, 1

    key = jax.random.PRNGKey(0)
    k_x, k_p = jax.random.split(key)

    x = jax.random.normal(k_x, (N, C_IN, H, W), jnp.float32)
    params = init_params(k_p, C_IN, C_OUT, K)

    out = basic_conv2d_forward(x, params, stride=STRIDE, padding=PAD)
    out = jax.block_until_ready(out)

    ref = reference_forward(x, params["conv_w"], params["conv_b"],
                            stride=STRIDE, padding=PAD)
    assert out.shape == ref.shape == (N, C_OUT, H, W)
    np.testing.assert_allclose(np.asarray(out), np.asarray(ref), rtol=2e-2, atol=2e-2)
    print("KERNEL_OK")
</pallas_src>

<mosaic_0001>
module attributes {stable_mosaic.version = 11 : i64} {
  func.func @kernel(%arg0: i32, %arg1: memref<1x4x290xbf16, #tpu.memory_space<vmem>>, %arg2: memref<9x1x256xbf16, #tpu.memory_space<vmem>>, %arg3: memref<8x36xbf16, #tpu.memory_space<vmem>>, %arg4: memref<8x1xf32, #tpu.memory_space<vmem>>, %arg5: memref<1x8x256xf32, #tpu.memory_space<vmem>>, %arg6: memref<36x256xbf16, #tpu.memory_space<vmem>>) attributes {dimension_semantics = [#tpu.dimension_semantics<parallel>], iteration_bounds = array<i64: 2>, scalar_prefetch = 0 : i64, scratch_operands = 1 : i64, tpu.core_type = #tpu.core_type<tc>, window_params = [{transform_indices = @transform_0, window_bounds = array<i64: 1, 4, 290>}, {pipeline_mode = #tpu.pipeline_mode<synchronous>, transform_indices = @transform_1, window_bounds = array<i64: 9, 1, 256>}, {pipeline_mode = #tpu.pipeline_mode<synchronous>, transform_indices = @transform_2, window_bounds = array<i64: 8, 36>}, {pipeline_mode = #tpu.pipeline_mode<synchronous>, transform_indices = @transform_3, window_bounds = array<i64: 8, 1>}, {transform_indices = @transform_4, window_bounds = array<i64: 1, 8, 256>}]} {
    %c0 = arith.constant 0 : index
    %c0_0 = arith.constant 0 : index
    %c0_1 = arith.constant 0 : index
    %0 = vector.load %arg1[%c0, %c0_0, %c0_1] : memref<1x4x290xbf16, #tpu.memory_space<vmem>>, vector<1x4x256xbf16>
    %1 = vector.shape_cast %0 : vector<1x4x256xbf16> to vector<4x256xbf16>
    %c0_2 = arith.constant 0 : index
    %c0_3 = arith.constant 0 : index
    %c0_4 = arith.constant 0 : index
    %2 = vector.load %arg2[%c0_2, %c0_3, %c0_4] : memref<9x1x256xbf16, #tpu.memory_space<vmem>>, vector<1x1x256xbf16>
    %3 = vector.shape_cast %2 : vector<1x1x256xbf16> to vector<1x256xbf16>
    %4 = vector.broadcast %3 : vector<1x256xbf16> to vector<4x256xbf16>
    %5 = arith.mulf %1, %4 : vector<4x256xbf16>
    %c0_5 = arith.constant 0 : index
    %c0_6 = arith.constant 0 : index
    %6 = vector.load %arg6[%c0_5, %c0_6] : memref<36x256xbf16, #tpu.memory_space<vmem>>, vector<4x256xbf16>
    tpu.vector_store %arg6[%c0_5, %c0_6], %5 {strides = array<i32>} : memref<36x256xbf16, #tpu.memory_space<vmem>>, vector<4x256xbf16>,
    %c0_7 = arith.constant 0 : index
    %c0_8 = arith.constant 0 : index
    %c1 = arith.constant 1 : index
    %7 = vector.load %arg1[%c0_7, %c0_8, %c1] : memref<1x4x290xbf16, #tpu.memory_space<vmem>>, vector<1x4x256xbf16>
    %8 = vector.shape_cast %7 : vector<1x4x256xbf16> to vector<4x256xbf16>
    %c1_9 = arith.constant 1 : index
    %c0_10 = arith.constant 0 : index
    %c0_11 = arith.constant 0 : index
    %9 = vector.load %arg2[%c1_9, %c0_10, %c0_11] : memref<9x1x256xbf16, #tpu.memory_space<vmem>>, vector<1x1x256xbf16>
    %10 = vector.shape_cast %9 : vector<1x1x256xbf16> to vector<1x256xbf16>
    %11 = vector.broadcast %10 : vector<1x256xbf16> to vector<4x256xbf16>
    %12 = arith.mulf %8, %11 : vector<4x256xbf16>
    %c4 = arith.constant 4 : index
    %c0_12 = arith.constant 0 : index
    %13 = vector.load %arg6[%c4, %c0_12] : memref<36x256xbf16, #tpu.memory_space<vmem>>, vector<4x256xbf16>
    tpu.vector_store %arg6[%c4, %c0_12], %12 {strides = array<i32>} : memref<36x256xbf16, #tpu.memory_space<vmem>>, vector<4x256xbf16>,
    %c0_13 = arith.constant 0 : index
    %c0_14 = arith.constant 0 : index
    %c2 = arith.constant 2 : index
    %14 = vector.load %arg1[%c0_13, %c0_14, %c2] : memref<1x4x290xbf16, #tpu.memory_space<vmem>>, vector<1x4x256xbf16>
    %15 = vector.shape_cast %14 : vector<1x4x256xbf16> to vector<4x256xbf16>
    %c2_15 = arith.constant 2 : index
    %c0_16 = arith.constant 0 : index
    %c0_17 = arith.constant 0 : index
    %16 = vector.load %arg2[%c2_15, %c0_16, %c0_17] : memref<9x1x256xbf16, #tpu.memory_space<vmem>>, vector<1x1x256xbf16>
    %17 = vector.shape_cast %16 : vector<1x1x256xbf16> to vector<1x256xbf16>
    %18 = vector.broadcast %17 : vector<1x256xbf16> to vector<4x256xbf16>
    %19 = arith.mulf %15, %18 : vector<4x256xbf16>
    %c8 = arith.constant 8 : index
    %c0_18 = arith.constant 0 : index
    %20 = vector.load %arg6[%c8, %c0_18] : memref<36x256xbf16, #tpu.memory_space<vmem>>, vector<4x256xbf16>
    tpu.vector_store %arg6[%c8, %c0_18], %19 {strides = array<i32>} : memref<36x256xbf16, #tpu.memory_space<vmem>>, vector<4x256xbf16>,
    %c0_19 = arith.constant 0 : index
    %c0_20 = arith.constant 0 : index
    %c16 = arith.constant 16 : index
    %21 = vector.load %arg1[%c0_19, %c0_20, %c16] : memref<1x4x290xbf16, #tpu.memory_space<vmem>>, vector<1x4x256xbf16>
    %22 = vector.shape_cast %21 : vector<1x4x256xbf16> to vector<4x256xbf16>
    %c3 = arith.constant 3 : index
    %c0_21 = arith.constant 0 : index
    %c0_22 = arith.constant 0 : index
    %23 = vector.load %arg2[%c3, %c0_21, %c0_22] : memref<9x1x256xbf16, #tpu.memory_space<vmem>>, vector<1x1x256xbf16>
    %24 = vector.shape_cast %23 : vector<1x1x256xbf16> to vector<1x256xbf16>
    %25 = vector.broadcast %24 : vector<1x256xbf16> to vector<4x256xbf16>
    %26 = arith.mulf %22, %25 : vector<4x256xbf16>
    %c12 = arith.constant 12 : index
    %c0_23 = arith.constant 0 : index
    %27 = vector.load %arg6[%c12, %c0_23] : memref<36x256xbf16, #tpu.memory_space<vmem>>, vector<4x256xbf16>
    tpu.vector_store %arg6[%c12, %c0_23], %26 {strides = array<i32>} : memref<36x256xbf16, #tpu.memory_space<vmem>>, vector<4x256xbf16>,
    %c0_24 = arith.constant 0 : index
    %c0_25 = arith.constant 0 : index
    %c17 = arith.constant 17 : index
    %28 = vector.load %arg1[%c0_24, %c0_25, %c17] : memref<1x4x290xbf16, #tpu.memory_space<vmem>>, vector<1x4x256xbf16>
    %29 = vector.shape_cast %28 : vector<1x4x256xbf16> to vector<4x256xbf16>
    %c4_26 = arith.constant 4 : index
    %c0_27 = arith.constant 0 : index
    %c0_28 = arith.constant 0 : index
    %30 = vector.load %arg2[%c4_26, %c0_27, %c0_28] : memref<9x1x256xbf16, #tpu.memory_space<vmem>>, vector<1x1x256xbf16>
    %31 = vector.shape_cast %30 : vector<1x1x256xbf16> to vector<1x256xbf16>
    %32 = vector.broadcast %31 : vector<1x256xbf16> to vector<4x256xbf16>
    %33 = arith.mulf %29, %32 : vector<4x256xbf16>
    %c16_29 = arith.constant 16 : index
    %c0_30 = arith.constant 0 : index
    %34 = vector.load %arg6[%c16_29, %c0_30] : memref<36x256xbf16, #tpu.memory_space<vmem>>, vector<4x256xbf16>
    tpu.vector_store %arg6[%c16_29, %c0_30], %33 {strides = array<i32>} : memref<36x256xbf16, #tpu.memory_space<vmem>>, vector<4x256xbf16>,
    %c0_31 = arith.constant 0 : index
    %c0_32 = arith.constant 0 : index
    %c18 = arith.constant 18 : index
    %35 = vector.load %arg1[%c0_31, %c0_32, %c18] : memref<1x4x290xbf16, #tpu.memory_space<vmem>>, vector<1x4x256xbf16>
    %36 = vector.shape_cast %35 : vector<1x4x256xbf16> to vector<4x256xbf16>
    %c5 = arith.constant 5 : index
    %c0_33 = arith.constant 0 : index
    %c0_34 = arith.constant 0 : index
    %37 = vector.load %arg2[%c5, %c0_33, %c0_34] : memref<9x1x256xbf16, #tpu.memory_space<vmem>>, vector<1x1x256xbf16>
    %38 = vector.shape_cast %37 : vector<1x1x256xbf16> to vector<1x256xbf16>
    %39 = vector.broadcast %38 : vector<1x256xbf16> to vector<4x256xbf16>
    %40 = arith.mulf %36, %39 : vector<4x256xbf16>
    %c20 = arith.constant 20 : index
    %c0_35 = arith.constant 0 : index
    %41 = vector.load %arg6[%c20, %c0_35] : memref<36x256xbf16, #tpu.memory_space<vmem>>, vector<4x256xbf16>
    tpu.vector_store %arg6[%c20, %c0_35], %40 {strides = array<i32>} : memref<36x256xbf16, #tpu.memory_space<vmem>>, vector<4x256xbf16>,
    %c0_36 = arith.constant 0 : index
    %c0_37 = arith.constant 0 : index
    %c32 = arith.constant 32 : index
    %42 = vector.load %arg1[%c0_36, %c0_37, %c32] : memref<1x4x290xbf16, #tpu.memory_space<vmem>>, vector<1x4x256xbf16>
    %43 = vector.shape_cast %42 : vector<1x4x256xbf16> to vector<4x256xbf16>
    %c6 = arith.constant 6 : index
    %c0_38 = arith.constant 0 : index
    %c0_39 = arith.constant 0 : index
    %44 = vector.load %arg2[%c6, %c0_38, %c0_39] : memref<9x1x256xbf16, #tpu.memory_space<vmem>>, vector<1x1x256xbf16>
    %45 = vector.shape_cast %44 : vector<1x1x256xbf16> to vector<1x256xbf16>
    %46 = vector.broadcast %45 : vector<1x256xbf16> to vector<4x256xbf16>
    %47 = arith.mulf %43, %46 : vector<4x256xbf16>
    %c24 = arith.constant 24 : index
    %c0_40 = arith.constant 0 : index
    %48 = vector.load %arg6[%c24, %c0_40] : memref<36x256xbf16, #tpu.memory_space<vmem>>, vector<4x256xbf16>
    tpu.vector_store %arg6[%c24, %c0_40], %47 {strides = array<i32>} : memref<36x256xbf16, #tpu.memory_space<vmem>>, vector<4x256xbf16>,
    %c0_41 = arith.constant 0 : index
    %c0_42 = arith.constant 0 : index
    %c33 = arith.constant 33 : index
    %49 = vector.load %arg1[%c0_41, %c0_42, %c33] : memref<1x4x290xbf16, #tpu.memory_space<vmem>>, vector<1x4x256xbf16>
    %50 = vector.shape_cast %49 : vector<1x4x256xbf16> to vector<4x256xbf16>
    %c7 = arith.constant 7 : index
    %c0_43 = arith.constant 0 : index
    %c0_44 = arith.constant 0 : index
    %51 = vector.load %arg2[%c7, %c0_43, %c0_44] : memref<9x1x256xbf16, #tpu.memory_space<vmem>>, vector<1x1x256xbf16>
    %52 = vector.shape_cast %51 : vector<1x1x256xbf16> to vector<1x256xbf16>
    %53 = vector.broadcast %52 : vector<1x256xbf16> to vector<4x256xbf16>
    %54 = arith.mulf %50, %53 : vector<4x256xbf16>
    %c28 = arith.constant 28 : index
    %c0_45 = arith.constant 0 : index
    %55 = vector.load %arg6[%c28, %c0_45] : memref<36x256xbf16, #tpu.memory_space<vmem>>, vector<4x256xbf16>
    tpu.vector_store %arg6[%c28, %c0_45], %54 {strides = array<i32>} : memref<36x256xbf16, #tpu.memory_space<vmem>>, vector<4x256xbf16>,
    %c0_46 = arith.constant 0 : index
    %c0_47 = arith.constant 0 : index
    %c34 = arith.constant 34 : index
    %56 = vector.load %arg1[%c0_46, %c0_47, %c34] : memref<1x4x290xbf16, #tpu.memory_space<vmem>>, vector<1x4x256xbf16>
    %57 = vector.shape_cast %56 : vector<1x4x256xbf16> to vector<4x256xbf16>
    %c8_48 = arith.constant 8 : index
    %c0_49 = arith.constant 0 : index
    %c0_50 = arith.constant 0 : index
    %58 = vector.load %arg2[%c8_48, %c0_49, %c0_50] : memref<9x1x256xbf16, #tpu.memory_space<vmem>>, vector<1x1x256xbf16>
    %59 = vector.shape_cast %58 : vector<1x1x256xbf16> to vector<1x256xbf16>
    %60 = vector.broadcast %59 : vector<1x256xbf16> to vector<4x256xbf16>
    %61 = arith.mulf %57, %60 : vector<4x256xbf16>
    %c32_51 = arith.constant 32 : index
    %c0_52 = arith.constant 0 : index
    %62 = vector.load %arg6[%c32_51, %c0_52] : memref<36x256xbf16, #tpu.memory_space<vmem>>, vector<4x256xbf16>
    tpu.vector_store %arg6[%c32_51, %c0_52], %61 {strides = array<i32>} : memref<36x256xbf16, #tpu.memory_space<vmem>>, vector<4x256xbf16>,
    %c0_53 = arith.constant 0 : index
    %c0_54 = arith.constant 0 : index
    %63 = vector.load %arg3[%c0_53, %c0_54] : memref<8x36xbf16, #tpu.memory_space<vmem>>, vector<8x36xbf16>
    %c0_55 = arith.constant 0 : index
    %c0_56 = arith.constant 0 : index
    %64 = vector.load %arg6[%c0_55, %c0_56] : memref<36x256xbf16, #tpu.memory_space<vmem>>, vector<36x256xbf16>
    %cst = arith.constant dense<0.000000e+00> : vector<8x256xf32>
    %65 = tpu.matmul %63, %64, %cst {dimension_numbers = #tpu.dot_dimension_numbers<[1], [0], [0], [1], [0, 0, 1, 1], [], []>} : vector<8x36xbf16>, vector<36x256xbf16>, vector<8x256xf32> -> vector<8x256xf32>
    %c0_57 = arith.constant 0 : index
    %c0_58 = arith.constant 0 : index
    %66 = vector.load %arg4[%c0_57, %c0_58] : memref<8x1xf32, #tpu.memory_space<vmem>>, vector<8x1xf32>
    %67 = vector.broadcast %66 : vector<8x1xf32> to vector<8x256xf32>
    %68 = arith.addf %65, %67 : vector<8x256xf32>
    %cst_59 = arith.constant 0.000000e+00 : f32
    %69 = vector.broadcast %cst_59 : f32 to vector<8x256xf32>
    %70 = arith.maximumf %68, %69 : vector<8x256xf32>
    %c0_60 = arith.constant 0 : index
    %c0_61 = arith.constant 0 : index
    %c0_62 = arith.constant 0 : index
    %71 = vector.load %arg5[%c0_60, %c0_61, %c0_62] : memref<1x8x256xf32, #tpu.memory_space<vmem>>, vector<1x8x256xf32>
    %72 = vector.shape_cast %71 : vector<1x8x256xf32> to vector<8x256xf32>
    %73 = vector.shape_cast %70 : vector<8x256xf32> to vector<1x8x256xf32>
    tpu.vector_store %arg5[%c0_60, %c0_61, %c0_62], %73 {strides = array<i32>} : memref<1x8x256xf32, #tpu.memory_space<vmem>>, vector<1x8x256xf32>,
    return
  }
  func.func @transform_0(%arg0: i32) -> (i32, i32, i32) {
    %c0_i32 = arith.constant 0 : i32
    %c0_i32_0 = arith.constant 0 : i32
    %c0_i32_1 = arith.constant 0 : i32
    return %arg0, %c0_i32, %c0_i32_0 : i32, i32, i32
  }
  func.func @transform_1(%arg0: i32) -> (i32, i32, i32) {
    %c0_i32 = arith.constant 0 : i32
    %c0_i32_0 = arith.constant 0 : i32
    %c0_i32_1 = arith.constant 0 : i32
    %c0_i32_2 = arith.constant 0 : i32
    return %c0_i32, %c0_i32_0, %c0_i32_1 : i32, i32, i32
  }
  func.func @transform_2(%arg0: i32) -> (i32, i32) {
    %c0_i32 = arith.constant 0 : i32
    %c0_i32_0 = arith.constant 0 : i32
    %c0_i32_1 = arith.constant 0 : i32
    return %c0_i32, %c0_i32_0 : i32, i32
  }
  func.func @transform_3(%arg0: i32) -> (i32, i32) {
    %c0_i32 = arith.constant 0 : i32
    %c0_i32_0 = arith.constant 0 : i32
    %c0_i32_1 = arith.constant 0 : i32
    return %c0_i32, %c0_i32_0 : i32, i32
  }
  func.func @transform_4(%arg0: i32) -> (i32, i32, i32) {
    %c0_i32 = arith.constant 0 : i32
    %c0_i32_0 = arith.constant 0 : i32
    %c0_i32_1 = arith.constant 0 : i32
    return %arg0, %c0_i32, %c0_i32_0 : i32, i32, i32
  }
}

</mosaic_0001>

<bundles_post_ra>
// kernel: tpu_custom_call.1
= control target key start
LH: loop header
LB: loop body
LE: loop exit
PB: predicated region body
PF: predicated region fallthrough
CT: control target
= control target key end

     0   :  { %9 = vsyncpa [#allocation4], 0  ;;  %s1251_s0 = inlined_call_operand.vmem [shape: bf16[2,4,290], index: 0, kind: input, shape index: {}]   ;;  %s1252_s1 = inlined_call_operand.vmem [shape: bf16[9,1,256], index: 1, kind: input, shape index: {}]   ;;  %s1253_s2 = inlined_call_operand.vmem [shape: bf16[8,36], index: 2, kind: input, shape index: {}]   ;;  %s1254_s3 = inlined_call_operand.vmem [shape: f32[8,1], index: 3, kind: input, shape index: {}]   ;;  %s1255_s4 = inlined_call_operand.hbm [shape: f32[2,8,256], index: 4, kind: output, shape index: {}]  }
   0x1   :  { %11 = vsyncpa [#allocation4 + $0x1], 0  ;;  %s1044_s15 = smov 0   ;;  %s1046_s16 = smov 0  }
   0x2   :  { %s1048_s17 = smov 0   ;;  %s1050_s18 = smov 0  }
   0x3 LB: > { %s1065_s19 = sadd.s32 4294967295, %s1000_s18   ;;  %s838_s20 = sadd.s32 4294967294, %s1000_s18   ;;  %s1000_s18 = sphi %s1050_s18, %s1261_s18   ;;  %s996_s17 = sphi %s1048_s17, %s1260_s17   ;;  %s992_s16 = sphi %s1046_s16, %s1259_s16   ;;  %s988_s15 = sphi %s1044_s15, %s1258_s15  }
   0x4   : > { %s1069_s21 = sadd.s32 1, %s1000_s18   ;;  %s113_s22 = sadd.s32 1, %s996_s17 }
   0x5   : > { %s110_s23 = ssub.s32 %s1000_s18, %s1069_s21  ;;  %p123_p0 = scmp.ne.s32.totalorder %s996_s17, %s992_s16 }
   0x6   : > { %p111_p1 = scmp.eq.s32.totalorder %s110_s23, 0  ;;  %p124_p2 = scmp.eq.s32.totalorder %s1065_s19, 1 }
   0x7   : > { %p129_p3 = scmp.ne.s32.totalorder %s992_s16, %s988_s15  ;;  %p130_p4 = scmp.eq.s32.totalorder %s838_s20, 1 }
   0x8   : > { %s1080_s24 = scalar_select %p111_p1, %s996_s17, %s113_s22  }
   0x9   : > { %p1082_p5 = por %p124_p2, %p123_p0  ;;  %p1086_p6 = por %p130_p4, %p129_p3 }
   0xa   : > { %p841_p7 = scmp.ge.s32.totalorder %s1000_s18, 1  ;;  %p165_p8 = scmp.lt.s32.totalorder %s1000_s18, 3 }
   0xc   : > { %p166_p9 = pnand %p841_p7, %p165_p8 }
   0xd   : > { %p191_p10 = scmp.lt.s32.totalorder (!%p166_p9), %s1065_s19, 1  ;;  %s1002_s10 = smov (!%p166_p9), 1  }
   0xe   : > { %169 = sbr.rel (%p166_p9) target bundleno = 1442 (0x5a2), region = 36  ;;  %s1003_s13 = smov (!%p166_p9), 2  }
   0xf   : > { %s1004_s22 = smov (!%p166_p9), 16   ;;  %s1005_s28 = smov (!%p166_p9), 17  }
  0x10   : > { %s1006_s5 = smov (!%p166_p9), 18   ;;  %s1007_s9 = smov (!%p166_p9), 32  }
  0x11   : > { %s1010_s14 = smov (!%p166_p9), 33   ;;  %s1011_s20 = smov (!%p166_p9), 110  }
  0x12   : > { %s1012_s27 = smov (!%p166_p9), 95   ;;  %s188_s11 = sand.u32 (!%p166_p9), 1, %s992_s16  }
  0x13   : > { %v198_v0 = vld [vmem:[%s1252_s1] sm:$0x3]  ;;  %s192_s29 = scalar_select %p191_p10, %s1065_s19, 1  ;;  %vm215_vm0 = vcmask 1043456   ;;  %v844_v14 = vld [vmem:[%s1252_s1 + $0x2] sm:$0x3] }
  0x14   : > { %200 = vst [vmem:[#allocation1] ss:$9 sm:$0xff] %v198_v0  ;;  %vm251_vm1 = vcmask 7168   ;;  %v845_v35 = vld [vmem:[%s1252_s1 + $0x4] sm:$0x3]  ;;  %vm310_vm2 = vcmask 15360  }
  0x15   : > { %s880_s30 = smul.u32 6, %s192_s29  ;;  %v846_v57 = vld [vmem:[%s1252_s1 + $0x6] sm:$0x3]  ;;  %vm366_vm3 = vcmask 130048   ;;  %vm424_vm4 = vcmask 138240   ;;  %vm480_vm5 = vcmask 146432  }
  0x16   : > { %vm538_vm6 = vcmask 261120   ;;  %vm594_vm7 = vcmask 269312   ;;  %vm566_vm8 = vcmask 785408   ;;  %s1014_s29 = smov 127   ;;  %vm652_vm9 = vcmask 277504   ;;  %s842_s12 = sshll.u32 %s188_s11, 4 }
  0x17   : > { %s1100_s7 = scalar_lea.vmem %s1251_s0, %s880_s30  ;;  %s1015_s30 = smov 112   ;;  %vm452_vm10 = vcmask 908288   ;;  %vm510_vm11 = vcmask 900096   ;;  %vm624_vm12 = vcmask 777216   ;;  %vm396_vm13 = vcmask 916480  }
  0x18   : > { %v197_v5 = vld [vmem:[%s1100_s7] sm:$0xf]  ;;  %vm680_vm14 = vcmask 769024   ;;  %vm282_vm15 = vcmask 1039360   ;;  %s190_s23 = scalar_lea.vmem [#allocation3], %s842_s12  ;;  %s958_s6 = scalar_lea.hbm %s1255_s4, 32 }
  0x19   : > { %v209_v10 = vunpack.c.l.bf16 %v197_v5  ;;  %v227_v27 = vld [vmem:[%s1100_s7] sm:$0x3f] }
  0x1a   : > { %v241_v28 = vunpack.c.h.bf16 %v227_v27  ;;  %v240_v29 = vunpack.c.l.bf16 %v227_v27  ;;  %v286_v49 = vld [vmem:[%s1100_s7] sm:$0x3f] }
  0x1b   : > { %v201_v1 = vld [vmem:[#allocation1] sm:$0xff]  ;;  %v202_v2 = vld [vmem:[#allocation1 + $0x9] sm:$0xff]  ;;  %v300_v50 = vunpack.c.h.bf16 %v286_v49  ;;  %v299_v51 = vunpack.c.l.bf16 %v286_v49 }
  0x1c   : > { %v203_v3 = vpack.i.b16 %v201_v1, %v201_v1  ;;  %v206_v4 = vpack.i.b16 %v202_v2, %v202_v2 }
  0x1e   : > { %v205_v6 = vperm.slane %v203_v3, 0  ;;  %v208_v7 = vperm.slane %v206_v4, 0 }
  0x20   : > { %v210_v8 = vunpack.c.l.bf16 %v205_v6  ;;  %v211_v9 = vunpack.c.l.bf16 %v208_v7  ;;  %v342_v7 = vld [vmem:[%s1100_s7] sm:$0x3f] }
  0x22   : > { %v214_v11 = vrot.slane %v211_v9, 4  ;;  %v355_v9 = vunpack.c.l.bf16 %v342_v7 }
  0x24   : > { %v216_v12 = vsel %vm215_vm0, %v210_v8, %v214_v11  ;;  %v356_v8 = vunpack.c.h.bf16 %v342_v7 }
  0x25   : > { %v218_v13 = vmul.f32 %v216_v12, %v209_v10 }
  0x27   : > { %220 = vst [vmem:[#allocation1] ss:$2 sm:$0xff] %v218_v13 }
  0x2e   : > { %v1107_v15 = vld.sshfl [vmem:[#allocation1] sm:$0xff pattern:$0x75316420]  ;;  %v1109_v16 = vld.sshfl [vmem:[#allocation1 + $0x8] sm:$0xff pattern:$0x75316420] }
  0x2f   : > { %231 = vst [vmem:[#allocation1] ss:$9 sm:$0xff] %v844_v14 }
  0x36   : > { %v232_v17 = vld [vmem:[#allocation1] sm:$0xff]  ;;  %v233_v18 = vld [vmem:[#allocation1 + $0x9] sm:$0xff] }
  0x37   : > { %v234_v19 = vpack.i.b16 %v232_v17, %v232_v17  ;;  %v237_v20 = vpack.i.b16 %v233_v18, %v233_v18  ;;  %v847_v17 = vld [vmem:[%s1252_s1 + $0x8] sm:$0x3] }
  0x39   : > { %v236_v21 = vperm.slane %v234_v19, 0  ;;  %v239_v22 = vperm.slane %v237_v20, 0 }
  0x3b   : > { %v242_v23 = vunpack.c.l.bf16 %v236_v21  ;;  %v243_v24 = vunpack.c.l.bf16 %v239_v22 }
  0x3d   : > { %v246_v25 = vrot.slane %v243_v24, 4 }
  0x3f   : > { %v247_v26 = vsel %vm215_vm0, %v242_v23, %v246_v25 }
  0x40   : > { %248 = vrot.lane.b32.xlu0 %v247_v26, %s1002_s10  ;;  %s1008_s10 = smov 111  }
  0xb2   : > { %v249_v30 = vpop.permute.xlu0 %248 }
  0xb3   : > { %v250_v31 = vrot.slane %v249_v30, 4 }
  0xb5   : > { %v252_v32 = vsel %vm251_vm1, %v250_v31, %v249_v30  ;;  %v256_v33 = vmul.f32 %v250_v31, %v241_v28  ;;  %v400_v31 = vld [vmem:[%s1100_s7] sm:$0x3f]  ;;  %vm725_vm1 = vcmask 1041408  }
  0xb6   : > { %v255_v34 = vmul.f32 %v252_v32, %v240_v29  ;;  %v414_v32 = vunpack.c.h.bf16 %v400_v31 }
  0xb7   : > { %261 = vst [vmem:[#allocation1 + $0x10] ss:$2 sm:$0xff] %v256_v33  ;;  %v413_v33 = vunpack.c.l.bf16 %v400_v31  ;;  %v850_v31 = vld [vmem:[%s1252_s1 + $0xe] sm:$0x3] }
  0xb8   : > { %259 = vst [vmem:[#allocation1] ss:$2 sm:$0xff] %v255_v34 }
  0xbe   : > { %v1116_v36 = vld.sshfl [vmem:[#allocation1 + $0x10] sm:$0xff pattern:$0x75316420] }
  0xbf   : > { %v1118_v37 = vld.sshfl [vmem:[#allocation1] sm:$0xff pattern:$0x75316420]  ;;  %v1120_v38 = vld.sshfl [vmem:[#allocation1 + $0x8] sm:$0xff pattern:$0x75316420] }
  0xc0   : > { %290 = vst [vmem:[#allocation1] ss:$9 sm:$0xff] %v845_v35 }
  0xc7   : > { %v292_v39 = vld [vmem:[#allocation1 + $0x9] sm:$0xff]  ;;  %v291_v40 = vld [vmem:[#allocation1] sm:$0xff] }
  0xc8   : > { %v293_v41 = vpack.i.b16 %v291_v40, %v291_v40  ;;  %v296_v42 = vpack.i.b16 %v292_v39, %v292_v39 }
  0xca   : > { %v295_v43 = vperm.slane %v293_v41, 0  ;;  %v298_v44 = vperm.slane %v296_v42, 0  ;;  %v848_v42 = vld [vmem:[%s1252_s1 + $0xa] sm:$0x3] }
  0xcc   : > { %v302_v45 = vunpack.c.l.bf16 %v298_v44  ;;  %v301_v46 = vunpack.c.l.bf16 %v295_v43 }
  0xce   : > { %v305_v47 = vrot.slane %v302_v45, 4 }
  0xd0   : > { %v306_v48 = vsel %vm215_vm0, %v301_v46, %v305_v47 }
  0xd1   : > { %307 = vrot.lane.b32.xlu0 %v306_v48, %s1003_s13  ;;  %s1009_s13 = smov 96  }
 0x143   : > { %v308_v52 = vpop.permute.xlu0 %307 }
 0x144   : > { %v309_v53 = vrot.slane %v308_v52, 4 }
 0x146   : > { %v311_v54 = vsel %vm310_vm2, %v309_v53, %v308_v52  ;;  %v315_v55 = vmul.f32 %v309_v53, %v300_v50  ;;  %vm338_vm2 = vcmask 1031168  }
 0x147   : > { %v314_v56 = vmul.f32 %v311_v54, %v299_v51 }
 0x148   : > { %320 = vst [vmem:[#allocation1 + $0x10] ss:$2 sm:$0xff] %v315_v55 }
 0x149   : > { %318 = vst [vmem:[#allocation1] ss:$2 sm:$0xff] %v314_v56  ;;  %v456_v56 = vld [vmem:[%s1100_s7] sm:$0x3f] }
 0x14f   : > { %v1127_v58 = vld.sshfl [vmem:[#allocation1 + $0x10] sm:$0xff pattern:$0x75316420] }
 0x150   : > { %v1129_v59 = vld.sshfl [vmem:[#allocation1] sm:$0xff pattern:$0x75316420]  ;;  %v1131_v60 = vld.sshfl [vmem:[#allocation1 + $0x8] sm:$0xff pattern:$0x75316420] }
 0x151   : > { %346 = vst [vmem:[#allocation1] ss:$9 sm:$0xff] %v846_v57  ;;  %v470_v57 = vunpack.c.h.bf16 %v456_v56 }
 0x158   : > { %v348_v61 = vld [vmem:[#allocation1 + $0x9] sm:$0xff]  ;;  %v347_v62 = vld [vmem:[#allocation1] sm:$0xff] }
 0x159   : > { %v349_v63 = vpack.i.b16 %v347_v62, %v347_v62  ;;  %v352_v0 = vpack.i.b16 %v348_v61, %v348_v61  ;;  %v469_v61 = vunpack.c.l.bf16 %v456_v56 }
 0x15b   : > { %v351_v1 = vperm.slane %v349_v63, 0  ;;  %v354_v2 = vperm.slane %v352_v0, 0 }
 0x15d   : > { %v358_v3 = vunpack.c.l.bf16 %v354_v2  ;;  %v357_v4 = vunpack.c.l.bf16 %v351_v1 }
 0x15f   : > { %v361_v5 = vrot.slane %v358_v3, 4  ;;  %v849_v3 = vld [vmem:[%s1252_s1 + $0xc] sm:$0x3] }
 0x161   : > { %v362_v6 = vsel %vm215_vm0, %v357_v4, %v361_v5 }
 0x162   : > { %363 = vrot.lane.b32.xlu1 %v362_v6, %s1004_s22 }
 0x1d4   : > { %v364_v10 = vpop.permute.xlu1 %363 }
 0x1d5   : > { %v365_v11 = vrot.slane %v364_v10, 4 }
 0x1d7   : > { %v367_v12 = vsel %vm366_vm3, %v365_v11, %v364_v10  ;;  %v371_v13 = vmul.f32 %v365_v11, %v356_v8 }
 0x1d8   : > { %v370_v14 = vmul.f32 %v367_v12, %v355_v9 }
 0x1d9   : > { %376 = vst [vmem:[#allocation1 + $0x10] ss:$2 sm:$0xff] %v371_v13 }
 0x1da   : > { %374 = vst [vmem:[#allocation1] ss:$2 sm:$0xff] %v370_v14 }
 0x1e0   : > { %v1138_v18 = vld.sshfl [vmem:[#allocation1 + $0x10] sm:$0xff pattern:$0x75316420] }
 0x1e1   : > { %v1140_v19 = vld.sshfl [vmem:[#allocation1] sm:$0xff pattern:$0x75316420]  ;;  %v1142_v20 = vld.sshfl [vmem:[#allocation1 + $0x8] sm:$0xff pattern:$0x75316420] }
 0x1e2   : > { %404 = vst [vmem:[#allocation1] ss:$9 sm:$0xff] %v847_v17 }
 0x1e9   : > { %v405_v21 = vld [vmem:[#allocation1] sm:$0xff]  ;;  %v406_v22 = vld [vmem:[#allocation1 + $0x9] sm:$0xff] }
 0x1ea   : > { %v407_v23 = vpack.i.b16 %v405_v21, %v405_v21  ;;  %v410_v24 = vpack.i.b16 %v406_v22, %v406_v22 }
 0x1ec   : > { %v409_v25 = vperm.slane %v407_v23, 0  ;;  %v412_v26 = vperm.slane %v410_v24, 0  ;;  %v514_v23 = vld [vmem:[%s1100_s7] sm:$0x3f] }
 0x1ed   : > { %v528_v24 = vunpack.c.h.bf16 %v514_v23 }
 0x1ee   : > { %v416_v27 = vunpack.c.l.bf16 %v412_v26  ;;  %v415_v28 = vunpack.c.l.bf16 %v409_v25  ;;  %v527_v25 = vunpack.c.l.bf16 %v514_v23 }
 0x1f0   : > { %v419_v29 = vrot.slane %v416_v27, 4 }
 0x1f2   : > { %v420_v30 = vsel %vm215_vm0, %v415_v28, %v419_v29 }
 0x1f3   : > { %421 = vrot.lane.b32.xlu1 %v420_v30, %s1005_s28  ;;  %s1013_s28 = smov 34  }
 0x265   : > { %v422_v34 = vpop.permute.xlu1 %421 }
 0x266   : > { %v423_v35 = vrot.slane %v422_v34, 4 }
 0x268   : > { %v425_v39 = vsel %vm424_vm4, %v423_v35, %v422_v34  ;;  %v429_v40 = vmul.f32 %v423_v35, %v414_v32 }
 0x269   : > { %v428_v41 = vmul.f32 %v425_v39, %v413_v33 }
 0x26a   : > { %434 = vst [vmem:[#allocation1 + $0x10] ss:$2 sm:$0xff] %v429_v40 }
 0x26b   : > { %432 = vst [vmem:[#allocation1] ss:$2 sm:$0xff] %v428_v41 }
 0x271   : > { %v437_v43 = vld.sshfl [vmem:[#allocation1 + $0x10] sm:$0xff pattern:$0x75316420] }
 0x272   : > { %v1149_v44 = vld.sshfl [vmem:[#allocation1] sm:$0xff pattern:$0x75316420]  ;;  %v1151_v45 = vld.sshfl [vmem:[#allocation1 + $0x8] sm:$0xff pattern:$0x75316420]  ;;  %v442_v22 = vpack.c.bf16 %v437_v43, %v437_v43 }
 0x273   : > { %460 = vst [vmem:[#allocation1] ss:$9 sm:$0xff] %v848_v42 }
 0x27a   : > { %v461_v46 = vld [vmem:[#allocation1] sm:$0xff]  ;;  %v462_v47 = vld [vmem:[#allocation1 + $0x9] sm:$0xff] }
 0x27b   : > { %v463_v48 = vpack.i.b16 %v461_v46, %v461_v46  ;;  %v466_v49 = vpack.i.b16 %v462_v47, %v462_v47 }
 0x27d   : > { %v465_v50 = vperm.slane %v463_v48, 0  ;;  %v468_v51 = vperm.slane %v466_v49, 0 }
 0x27f   : > { %v472_v52 = vunpack.c.l.bf16 %v468_v51  ;;  %v471_v53 = vunpack.c.l.bf16 %v465_v50 }
 0x281   : > { %v475_v54 = vrot.slane %v472_v52, 4 }
 0x283   : > { %v476_v55 = vsel %vm215_vm0, %v471_v53, %v475_v54  ;;  %v570_v54 = vld [vmem:[%s1100_s7] sm:$0x3f] }
 0x284   : > { %477 = vrot.lane.b32.xlu2 %v476_v55, %s1006_s5  ;;  %v584_v55 = vunpack.c.h.bf16 %v570_v54  ;;  %v583_v56 = vunpack.c.l.bf16 %v570_v54  ;;  %s1017_s5 = smov 126  }
 0x2de   : > { %v478_v62 = vpop.permute.xlu2 %477 }
 0x2df   : > { %v479_v63 = vrot.slane %v478_v62, 4 }
 0x2e1   : > { %v481_v0 = vsel %vm480_vm5, %v479_v63, %v478_v62  ;;  %v485_v1 = vmul.f32 %v479_v63, %v470_v57 }
 0x2e2   : > { %v484_v2 = vmul.f32 %v481_v0, %v469_v61 }
 0x2e3   : > { %490 = vst [vmem:[#allocation1 + $0x10] ss:$2 sm:$0xff] %v485_v1 }
 0x2e4   : > { %488 = vst [vmem:[#allocation1] ss:$2 sm:$0xff] %v484_v2 }
 0x2ea   : > { %v1158_v4 = vld.sshfl [vmem:[#allocation1 + $0x10] sm:$0xff pattern:$0x75316420] }
 0x2eb   : > { %v491_v5 = vld.sshfl [vmem:[#allocation1] sm:$0xff pattern:$0x75316420]  ;;  %v492_v6 = vld.sshfl [vmem:[#allocation1 + $0x8] sm:$0xff pattern:$0x75316420] }
 0x2ec   : > { %518 = vst [vmem:[#allocation1] ss:$9 sm:$0xff] %v849_v3  ;;  %v497_v51 = vpack.c.bf16 %v492_v6, %v491_v5  ;;  %v851_v3 = vld [vmem:[%s1252_s1 + $0x10] sm:$0x3] }
 0x2ee   : > { %v501_v52 = vrot.slane %v497_v51, 6 }
 0x2f3   : > { %v519_v7 = vld [vmem:[#allocation1] sm:$0xff]  ;;  %v520_v8 = vld [vmem:[#allocation1 + $0x9] sm:$0xff] }
 0x2f4   : > { %v521_v9 = vpack.i.b16 %v519_v7, %v519_v7  ;;  %v524_v10 = vpack.i.b16 %v520_v8, %v520_v8 }
 0x2f6   : > { %v523_v11 = vperm.slane %v521_v9, 0  ;;  %v526_v12 = vperm.slane %v524_v10, 0 }
 0x2f8   : > { %v530_v13 = vunpack.c.l.bf16 %v526_v12  ;;  %v529_v14 = vunpack.c.l.bf16 %v523_v11 }
 0x2fa   : > { %v533_v17 = vrot.slane %v530_v13, 4 }
 0x2fc   : > { %v534_v21 = vsel %vm215_vm0, %v529_v14, %v533_v17 }
 0x2fd   : > { %535 = vrot.lane.b32.xlu2 %v534_v21, %s1007_s9 }
 0x305   : > { %447 = vrot.lane.b32.xlu2 %v442_v22, %s1008_s10 }
 0x357   : > { %v536_v26 = vpop.permute.xlu2 %535 }
 0x358   : > { %v537_v27 = vrot.slane %v536_v26, 4 }
 0x35a   : > { %v539_v28 = vsel %vm538_vm6, %v537_v27, %v536_v26  ;;  %v543_v29 = vmul.f32 %v537_v27, %v528_v24 }
 0x35b   : > { %v542_v30 = vmul.f32 %v539_v28, %v527_v25 }
 0x35c   : > { %548 = vst [vmem:[#allocation1 + $0x10] ss:$2 sm:$0xff] %v543_v29 }
 0x35d   : > { %546 = vst [vmem:[#allocation1] ss:$2 sm:$0xff] %v542_v30 }
 0x35f   : > { %v1169_v1 = vpop.permute.xlu2 %447 }
 0x363   : > { %v551_v32 = vld.sshfl [vmem:[#allocation1 + $0x10] sm:$0xff pattern:$0x75316420] }
 0x364   : > { %v549_v33 = vld.sshfl [vmem:[#allocation1] sm:$0xff pattern:$0x75316420]  ;;  %v550_v34 = vld.sshfl [vmem:[#allocation1 + $0x8] sm:$0xff pattern:$0x75316420]  ;;  %v556_v53 = vpack.c.bf16 %v551_v32, %v551_v32  ;;  %v498_v32 = vpack.c.bf16 %v1158_v4, %v1158_v4 }
 0x365   : > { %v555_v35 = vpack.c.bf16 %v550_v34, %v549_v33  ;;  %574 = vst [vmem:[#allocation1] ss:$9 sm:$0xff] %v850_v31  ;;  %v441_v31 = vpack.c.bf16 %v1151_v45, %v1149_v44  ;;  %v383_v44 = vpack.c.bf16 %v1142_v20, %v1140_v19  ;;  %v628_v4 = vld [vmem:[%s1100_s7] sm:$0x3f]  ;;  %s1016_s7 = smov 94  }
 0x366   : > { %v502_v33 = vrot.slane %v498_v32, 6 }
 0x367   : > { %559 = vrot.lane.b32.xlu2 %v555_v35, %s1009_s13  ;;  %v387_v45 = vrot.slane %v383_v44, 6 }
 0x36c   : > { %v575_v39 = vld [vmem:[#allocation1] sm:$0xff]  ;;  %v576_v40 = vld [vmem:[#allocation1 + $0x9] sm:$0xff] }
 0x36d   : > { %v577_v41 = vpack.i.b16 %v575_v39, %v575_v39  ;;  %v580_v42 = vpack.i.b16 %v576_v40, %v576_v40  ;;  %v269_v39 = vpack.c.bf16 %v1116_v36, %v1116_v36 }
 0x36f   : > { %v579_v43 = vperm.slane %v577_v41, 0  ;;  %v582_v46 = vperm.slane %v580_v42, 0  ;;  %v273_v40 = vrot.slane %v269_v39, 6  ;;  %v642_v41 = vunpack.c.h.bf16 %v628_v4 }
 0x370   : > { %v641_v42 = vunpack.c.l.bf16 %v628_v4 }
 0x371   : > { %v586_v47 = vunpack.c.l.bf16 %v582_v46  ;;  %v585_v48 = vunpack.c.l.bf16 %v579_v43 }
 0x373   : > { %v589_v49 = vrot.slane %v586_v47, 4 }
 0x375   : > { %v590_v50 = vsel %vm215_vm0, %v585_v48, %v589_v49 }
 0x376   : > { %591 = vrot.lane.b32.xlu0 %v590_v50, %s1010_s14  ;;  %v450_v50 = vrot.slane %v1169_v1, 4 }
 0x37e   : > { %503 = vrot.lane.b32.xlu0 %v501_v52, %s1011_s20 }
 0x386   : > { %561 = vrot.lane.b32.xlu0 %v556_v53, %s1009_s13  ;;  %s879_s13 = sshll.u32 %s1065_s19, 4  ;;  %s763_s19 = scalar_lea.sflag [#allocation4], %s188_s11 }
 0x387   : > { %s774_s22 = scalar_lea.hbm %s1255_s4, %s879_s13 }
 0x3c1   : > { %v560_v9 = vpop.permute.xlu2 %559 }
 0x3c2   : > { %v563_v12 = vrot.slane %v560_v9, 4 }
 0x3e8   : > { %v592_v57 = vpop.permute.xlu0 %591 }
 0x3e9   : > { %v593_v61 = vrot.slane %v592_v57, 4 }
 0x3eb   : > { %v595_v62 = vsel %vm594_vm7, %v593_v61, %v592_v57  ;;  %v599_v63 = vmul.f32 %v593_v61, %v584_v55 }
 0x3ec   : > { %v598_v0 = vmul.f32 %v595_v62, %v583_v56 }
 0x3ed   : > { %604 = vst [vmem:[#allocation1 + $0x10] ss:$2 sm:$0xff] %v599_v63  ;;  %v268_v63 = vpack.c.bf16 %v1120_v38, %v1118_v37  ;;  %v384_v38 = vpack.c.bf16 %v1138_v18, %v1138_v18 }
 0x3ee   : > { %602 = vst [vmem:[#allocation1] ss:$2 sm:$0xff] %v598_v0 }
 0x3f0   : > { %v1171_v2 = vpop.permute.xlu0 %503 }
 0x3f1   : > { %v507_v61 = vrot.slane %v1171_v2, 4 }
 0x3f4   : > { %v607_v5 = vld.sshfl [vmem:[#allocation1 + $0x10] sm:$0xff pattern:$0x75316420] }
 0x3f5   : > { %v612_v6 = vpack.c.bf16 %v607_v5, %v607_v5  ;;  %v605_v7 = vld.sshfl [vmem:[#allocation1] sm:$0xff pattern:$0x75316420]  ;;  %v606_v8 = vld.sshfl [vmem:[#allocation1 + $0x8] sm:$0xff pattern:$0x75316420] }
 0x3f6   : > { %632 = vst [vmem:[#allocation1] ss:$9 sm:$0xff] %v851_v3  ;;  %v611_v34 = vpack.c.bf16 %v606_v8, %v605_v7  ;;  %v272_v3 = vrot.slane %v268_v63, 6 }
 0x3f7   : > { %v616_v10 = vrot.slane %v612_v6, 6  ;;  %v327_v6 = vpack.c.bf16 %v1131_v60, %v1129_v59  ;;  %v225_v60 = vpack.c.bf16 %v1109_v16, %v1107_v15  ;;  %v690_v15 = vld [vmem:[%s1254_s3] sm:$0xff] }
 0x3f8   : > { %v562_v11 = vpop.permute.xlu0 %561  ;;  %v615_v35 = vrot.slane %v611_v34, 6 }
 0x3f9   : > { %v564_v13 = vrot.slane %v562_v11, 4  ;;  %619 = vrot.lane.b32.xlu2 %v616_v10, %s1012_s27  ;;  %v328_v10 = vpack.c.bf16 %v1127_v58, %v1127_v58  ;;  %v388_v11 = vrot.slane %v384_v38, 6  ;;  %226 = vst [vmem:[#allocation2] sm:$0x33] %v225_v60 }
 0x3fb   : > { %v565_v14 = vsel %vm215_vm0, %v563_v12, %v564_v13 }
 0x3fc   : > { %v567_v17 = vsel %vm566_vm8, %v560_v9, %v565_v14 }
 0x3fd   : > { %569 = vst [vmem:[#allocation2 + $0x18] sm:$0x33] %v567_v17  ;;  %v633_v21 = vld [vmem:[#allocation1] sm:$0xff]  ;;  %v634_v22 = vld [vmem:[#allocation1 + $0x9] sm:$0xff] }
 0x3fe   : > { %v635_v23 = vpack.i.b16 %v633_v21, %v633_v21  ;;  %v638_v24 = vpack.i.b16 %v634_v22, %v634_v22 }
 0x400   : > { %v637_v25 = vperm.slane %v635_v23, 0  ;;  %v640_v26 = vperm.slane %v638_v24, 0 }
 0x402   : > { %v644_v27 = vunpack.c.l.bf16 %v640_v26  ;;  %v643_v28 = vunpack.c.l.bf16 %v637_v25  ;;  %v1018_v26 = vmov 0  }
 0x403   : > { %937 = vset.pattern.permute.xlu0 %v1018_v26 }
 0x404   : > { %v647_v29 = vrot.slane %v644_v27, 4 }
 0x406   : > { %v648_v30 = vsel %vm215_vm0, %v643_v28, %v647_v29 }
 0x407   : > { %649 = vrot.lane.b32.xlu1 %v648_v30, %s1013_s28  ;;  %s778_s28 = sshll.u32 %s774_s22, 4  ;;  %s779_s28 = int_to_ptr.hbm [resolvable:$true] %s778_s28 }
 0x40f   : > { %445 = vrot.lane.b32.xlu1 %v441_v31, %s1008_s10 }
 0x417   : > { %505 = vrot.lane.b32.xlu1 %v502_v33, %s1011_s20 }
 0x41f   : > { %617 = vrot.lane.b32.xlu1 %v615_v35, %s1012_s27  ;;  %s776_s27 = sshll.u32 %s190_s23, 4  ;;  %s777_s27 = int_to_ptr.vmem [resolvable:$true] %s776_s27 }
 0x427   : > { %276 = vrot.lane.b32.xlu1 %v273_v40, %s1014_s29 }
 0x42f   : > { %389 = vrot.lane.b32.xlu1 %v387_v45, %s1015_s30 }
 0x453   : > { %v620_v5 = vpop.permute.xlu2 %619 }
 0x454   : > { %v622_v8 = vrot.slane %v620_v5, 4 }
 0x479   : > { %v650_v43 = vpop.permute.xlu1 %649 }
 0x47a   : > { %v651_v46 = vrot.slane %v650_v43, 4 }
 0x47c   : > { %v653_v47 = vsel %vm652_vm9, %v651_v46, %v650_v43  ;;  %v657_v48 = vmul.f32 %v651_v46, %v642_v41 }
 0x47d   : > { %v656_v36 = vmul.f32 %v653_v47, %v641_v42 }
 0x47e   : > { %662 = vst [vmem:[#allocation1 + $0x10] ss:$2 sm:$0xff] %v657_v48 }
 0x47f   : > { %660 = vst [vmem:[#allocation1] ss:$2 sm:$0xff] %v656_v36 }
 0x481   : > { %v446_v49 = vpop.permute.xlu1 %445 }
 0x482   : > { %v449_v19 = vrot.slane %v446_v49, 4 }
 0x484   : > { %v451_v20 = vsel %vm215_vm0, %v449_v19, %v450_v50 }
 0x485   : > { %v453_v51 = vsel %vm452_vm10, %v446_v49, %v451_v20  ;;  %v665_v52 = vld.sshfl [vmem:[#allocation1 + $0x10] sm:$0xff pattern:$0x75316420] }
 0x486   : > { %455 = vst [vmem:[#allocation2 + $0x10] sm:$0x33] %v453_v51  ;;  %v670_v53 = vpack.c.bf16 %v665_v52, %v665_v52  ;;  %v663_v54 = vld.sshfl [vmem:[#allocation1] sm:$0xff pattern:$0x75316420] }
 0x487   : > { %v664_v55 = vld.sshfl [vmem:[#allocation1 + $0x8] sm:$0xff pattern:$0x75316420] }
 0x488   : > { %675 = vrot.lane.b32.xlu0 %v670_v53, %s1016_s7  ;;  %v669_v56 = vpack.c.bf16 %v664_v55, %v663_v54 }
 0x489   : > { %v506_v57 = vpop.permute.xlu1 %505 }
 0x48a   : > { %673 = vrot.lane.b32.xlu2 %v669_v56, %s1016_s7  ;;  %v508_v62 = vrot.slane %v506_v57, 4  ;;  %v684_v56 = vld [vmem:[%s1253_s2] sm:$0xf] }
 0x48c   : > { %v509_v0 = vsel %vm215_vm0, %v507_v61, %v508_v62 }
 0x48d   : > { %v511_v1 = vsel %vm510_vm11, %v1171_v2, %v509_v0 }
 0x48e   : > { %513 = vst [vmem:[#allocation2 + $0x10] sm:$0xcc] %v511_v1 }
 0x490   : > { %274 = vrot.lane.b32.xlu0 %v272_v3, %s1014_s29  ;;  %s952_s29 = sshra.s32 %s779_s28, 4  ;;  %s953_s29 = int_to_ptr.hbm [resolvable:$true] %s952_s29 }
 0x491   : > { %v618_v7 = vpop.permute.xlu1 %617  ;;  %p959_p0 = scmp.lt.s32.totalorder %s953_s29, %s1255_s4 }
 0x492   : > { %v621_v9 = vrot.slane %v618_v7, 4  ;;  %331 = vrot.lane.b32.xlu2 %v327_v6, %s1017_s5 }
 0x494   : > { %v623_v37 = vsel %vm215_vm0, %v621_v9, %v622_v8 }
 0x495   : > { %v625_v2 = vsel %vm624_vm12, %v618_v7, %v623_v37  ;;  %v862_v48 = vld [vmem:[#allocation2 + $0x10] sm:$0xf]  ;;  %v877_v36 = vld [vmem:[#allocation2 + $0x14] sm:$0xf] }
 0x496   : > { %627 = vst [vmem:[#allocation2 + $0x18] sm:$0xcc] %v625_v2 }
 0x498   : > { %333 = vrot.lane.b32.xlu0 %v328_v10, %s1017_s5 }
 0x499   : > { %v277_v12 = vpop.permute.xlu1 %276 }
 0x49a   : > { %391 = vrot.lane.b32.xlu2 %v388_v11, %s1015_s30  ;;  %v279_v29 = vrot.slane %v277_v12, 4  ;;  %s954_s30 = scalar_lea.hbm %s953_s29, 16 }
 0x49b   : > { %p955_p11 = scmp.ne.s32.totalorder %s953_s29, %s954_s30  ;;  %p960_p1 = scmp.lt.s32.totalorder %s958_s6, %s954_s30 }
 0x49d   : > { %v878_v45 = vld [vmem:[#allocation2 + $0x14] sm:$0xf0]  ;;  %v864_v46 = vld [vmem:[#allocation2 + $0x18] sm:$0xf0]  ;;  %p956_p12 = pnand %p955_p11, %p1082_p5  ;;  %p961_p2 = por %p960_p1, %p959_p0 }
 0x49e   : > { %v863_v50 = vor.u32 %v878_v45, %v862_v48  ;;  %v867_v19 = vor.u32 %v877_v36, %v864_v46 }
 0x49f   : > { %p957_p13 = pneg %p956_p12 }
 0x4a0   : > { %693 = vperm.xlu0 %937, %v690_v15  }
 0x4a1   : > { %v390_v14 = vpop.permute.xlu1 %389  ;;  %p962_p3 = pnand %p961_p2, %p957_p13 }
 0x4a2   : > { %v393_v21 = vrot.slane %v390_v14, 4 }
 0x4e4   : > { %v674_v59 = vpop.permute.xlu2 %673 }
 0x4e5   : > { %v677_v24 = vrot.slane %v674_v59, 4 }
 0x4ec   : > { %v332_v13 = vpop.permute.xlu2 %331 }
 0x4ed   : > { %v335_v4 = vrot.slane %v332_v13, 4 }
 0x4f4   : > { %v392_v17 = vpop.permute.xlu2 %391 }
 0x4f5   : > { %v394_v18 = vrot.slane %v392_v17, 4 }
 0x4f7   : > { %v395_v22 = vsel %vm215_vm0, %v393_v21, %v394_v18 }
 0x4f8   : > { %v397_v23 = vsel %vm396_vm13, %v390_v14, %v395_v22 }
 0x4f9   : > { %399 = vst [vmem:[#allocation2 + $0x8] sm:$0xcc] %v397_v23 }
 0x4fa   : > { %v676_v58 = vpop.permute.xlu0 %675 }
 0x4fb   : > { %v678_v25 = vrot.slane %v676_v58, 4 }
 0x4fd   : > { %v679_v16 = vsel %vm215_vm0, %v677_v24, %v678_v25 }
 0x4fe   : > { %v681_v27 = vsel %vm680_vm14, %v674_v59, %v679_v16 }
 0x4ff   : > { %683 = vst [vmem:[#allocation2 + $0x20] sm:$0x33] %v681_v27 }
 0x502   : > { %v275_v28 = vpop.permute.xlu0 %274 }
 0x503   : > { %v278_v30 = vrot.slane %v275_v28, 4 }
 0x505   : > { %v281_v31 = vsel %vm215_vm0, %v278_v30, %v279_v29 }
 0x506   : > { %v283_v32 = vsel %vm282_vm15, %v275_v28, %v281_v31  ;;  %v689_v33 = vld [vmem:[#allocation2 + $0x20] sm:$0x33] }
 0x507   : > { %285 = vst [vmem:[#allocation2] sm:$0xcc] %v283_v32  ;;  %v709_v34 = vunpack.c.l.b16 %v689_v33  ;;  %v710_v35 = vunpack.c.h.b16 %v689_v33 }
 0x509   : > { %v715_v39 = vpack.c.b16 %v709_v34, %v709_v34  ;;  %v716_v40 = vpack.c.b16 %v710_v35, %v710_v35 }
 0x50a   : > { %v334_v44 = vpop.permute.xlu0 %333 }
 0x50b   : > { %v336_v41 = vrot.slane %v334_v44, 4  ;;  %v727_v42 = vsel %vm725_vm1, %v715_v39, 0  ;;  %v730_v43 = vsel %vm725_vm1, %v716_v40, 0 }
 0x50c   : > { %737 = vmatpush.bf16.msra.mxu0 %v727_v42  ;;  %750 = vmatpush.bf16.msra.mxu1 %v730_v43 }
 0x50d   : > { %v337_v47 = vsel %vm215_vm0, %v335_v4, %v336_v41  ;;  %vm721_vm0 = vcmask 293888  }
 0x50e   : > { %v339_v49 = vsel %vm338_vm2, %v332_v13, %v337_v47  ;;  %v854_v20 = vld [vmem:[#allocation2] sm:$0xf]  ;;  %v875_v52 = vld [vmem:[#allocation2 + $0x4] sm:$0xf] }
 0x50f   : > { %341 = vst [vmem:[#allocation2 + $0x8] sm:$0x33] %v339_v49 }
 0x510   : > { %738 = vmatpush.bf16.msra.mxu0 %v863_v50  ;;  %751 = vmatpush.bf16.msra.mxu1 %v867_v19 }
 0x512   : > { %v694_v57 = vpop.permute.xlu0 %693 }
 0x516   : > { %v876_v51 = vld [vmem:[#allocation2 + $0x4] sm:$0xf0]  ;;  %v856_v53 = vld [vmem:[#allocation2 + $0x8] sm:$0xf0] }
 0x517   : > { %v855_v54 = vor.u32 %v876_v51, %v854_v20  ;;  %v859_v55 = vor.u32 %v875_v52, %v856_v53 }
 0x519   : > { %739 = vmatpush.bf16.msra.mxu0 %v855_v54  ;;  %752 = vmatpush.bf16.msra.mxu1 %v859_v55 }
 0x51c   : > { %868 = vmatmul.msk.bf16.vlgmr.msra.gmra.mxu0 %vm721_vm0, %v684_v56  ;;  %869 = vmatmul.msk.bf16.vlgmr.msra.gmra.mxu1 %vm721_vm0, %v684_v56 }
 0x599   : > { %v741_v61 = vpop.f32.mrf.mxu0  ;;  %v754_v62 = vpop.f32.mrf.mxu1 }
 0x59a   : > { %v742_v63 = vadd.f32 %v741_v61, %v694_v57  ;;  %v755_v0 = vadd.f32 %v754_v62, %v694_v57 }
 0x59c   : > { %v758_v1 = vmax.f32 %v742_v63, 0.0  ;;  %v759_v3 = vmax.f32 %v755_v0, 0.0 }
 0x59e   : > { %760 = vst [vmem:[%s190_s23] sm:$0xff] %v758_v1 }
 0x59f   : > { %761 = vst [vmem:[%s190_s23 + $0x8] sm:$0xff] %v759_v3 }
 0x5a0   : > { %965 = shalt.err (!%p962_p3)
}
 0x5a1   : > { %881 = dma.vmem_to_hbm [thread:$0]  (%p1082_p5), %s777_s27, 256, %s779_s28, %s763_s19   ;;  %v743_v5 = vpop.f32.mrf.mxu0  ;;  %v756_v6 = vpop.f32.mrf.mxu1 }
 0x5a2 PF: > { %p887_p4 = scmp.ge.s32.totalorder %s1000_s18, 2  ;;  %s790_s10 = sand.u32 1, %s988_s15  }
 0x5a3   : > { %s791_s11 = scalar_lea.sflag [#allocation4], %s790_s10 }
 0x5a4   : > { %p884_p7 = pnand %p887_p4, %p1086_p6 }
 0x5a6   : > { %p885_p8 = pneg %p884_p7 }
 0x5a8   : > { %983 = dma.done.wait (%p885_p8), %s791_s11, 256  }
 0x5a9   : > { %985 = vsyncadd (%p885_p8), %s791_s11, 4294967040  ;;  %p14_p5 = scmp.ge.s32.totalorder %s1069_s21, 4   ;;  %s1258_s15 = smov %s992_s16 }
 0x5aa   : > { %s1259_s16 = smov %s996_s17  ;;  %s1260_s17 = smov %s1080_s24 }
 0x5ab   : > { %s1261_s18 = smov %s1069_s21  ;;  %16 = sbr.rel (!%p14_p5) target bundleno = 3 (0x3), region = 87 }
 0x5b0   :  { %797 = vsyncpa [#allocation4], 1 }
 0x5b1   :  { %799 = vsyncpa [#allocation4 + $0x1], 1 }

</bundles_post_ra>
